<compile_context>
chip_gen: v6e
topology: v6e:2x2x1
jax: 0.10.0
libtpu: 0.0.40
codegen_flags: <defaults>
</compile_context>

<pallas_src>
import jax
import jax.numpy as jnp
from jax import lax
from jax.experimental import pallas as pl
from jax.experimental.pallas import tpu as pltpu

_SUBLANE = 8            # f32/int32 sublane granularity
_GROUP = 8              # rows per aligned full-tile store in the gather path
_MAX_TOK_BLOCK = 1024   # upper bound on tokens per grid step
_ONE_HOT_MAX_V = 2048   # one-hot MXU gather only for vocabularies up to this size
_NSEM = 16              # outstanding row DMAs in the HBM path (v6e/v7x feedback)


def _vmem_capacity_bytes():
    try:
        cap = int(getattr(pltpu.get_tpu_info(), "vmem_capacity_bytes", 0))
        if cap > 0:
            return cap
    except Exception:
        pass
    try:
        kind = jax.devices()[0].device_kind.lower()
    except Exception:
        kind = ""
    # v7x has 64 MiB of VMEM per TensorCore; v5e/v6e have 128 MiB.
    return (64 << 20) if "7" in kind else (128 << 20)


def _round_up(x, m):
    return ((x + m - 1) // m) * m


def _round_down_to(x, m):
    return max(m, (x // m) * m)


def _pick_tok_block(n_tok, row_bytes, *, onehot_cols_bytes=None):
    """Tokens per grid step: multiple of 8 sublanes, output block up to ~1 MiB."""
    blk = min(_MAX_TOK_BLOCK, _round_down_to((1 << 20) // max(1, row_bytes), _SUBLANE))
    if onehot_cols_bytes is not None:
        # keep the (tok_block, V) one-hot intermediate around <= 2 MiB
        blk = min(blk, _round_down_to((2 << 20) // max(1, onehot_cols_bytes), _SUBLANE))
    blk = min(blk, _round_up(n_tok, _SUBLANE))
    return max(_SUBLANE, blk)


def _table_spec(V, D, index_map, single_buffer):
    """Whole-table VMEM BlockSpec; single-buffered when supported (constant index_map)."""
    if single_buffer and hasattr(pl, "Buffered"):
        return pl.BlockSpec((V, D), index_map, pipeline_mode=pl.Buffered(1))
    return pl.BlockSpec((V, D), index_map)


# --------------------------------------------------------------------------------------
# Kernels
# --------------------------------------------------------------------------------------

def _onehot_kernel(ids_ref, table_ref, out_ref):
    """Vectorized gather: one_hot(ids) @ table on the MXU (bit-exact for 16-bit tables)."""
    tok_block = out_ref.shape[0]
    vocab = table_ref.shape[0]
    ids = ids_ref[...]                                               # (tok_block, 1) int32
    iota = lax.broadcasted_iota(jnp.int32, (tok_block, vocab), 1)
    onehot = jnp.where(ids == iota, 1.0, 0.0).astype(table_ref.dtype)  # (tok_block, V)
    out_ref[...] = jnp.dot(
        onehot, table_ref[...], preferred_element_type=jnp.float32
    ).astype(out_ref.dtype)


def _gather_kernel(ids_ref, table_ref, out_ref):
    """Table resident in VMEM; gather 8 rows per group, one aligned (8, D) store each."""
    tok_block = out_ref.shape[0]
    base = pl.program_id(0) * tok_block

    def body(g, carry):
        start = pl.multiple_of(g * _GROUP, _GROUP)
        rows = [
            table_ref[pl.ds(ids_ref[base + start + k], 1), :] for k in range(_GROUP)
        ]
        # Single unmasked full-tile store instead of 8 masked (1, D) stores.
        out_ref[pl.ds(start, _GROUP), :] = jnp.concatenate(rows, axis=0)
        return carry

    lax.fori_loop(0, tok_block // _GROUP, body, 0)


def _hbm_kernel(ids_ref, table_hbm, out_ref, sem):
    """Table stays in HBM; each row is DMA'd directly into the output block."""
    tok_block = out_ref.shape[0]
    base = pl.program_id(0) * tok_block

    def row_copy(tok, t, slot):
        # NOTE: the dummy (tok=0, t=0) descriptors used for waits are only valid because
        # every DMA in this kernel transfers exactly one (1, D) row of identical byte size.
        return pltpu.make_async_copy(
            table_hbm.at[pl.ds(tok, 1), :],
            out_ref.at[pl.ds(t, 1), :],
            sem.at[slot],
        )

    n_prime = min(_NSEM, tok_block)

    @pl.loop(0, n_prime)
    def _(t):
        row_copy(ids_ref[base + t], t, t & (_NSEM - 1)).start()

    if tok_block > _NSEM:
        @pl.loop(_NSEM, tok_block)
        def _(t):
            tok = ids_ref[base + t]      # read the id BEFORE the wait (keeps sst->sld fwd)
            slot = t & (_NSEM - 1)
            row_copy(0, 0, slot).wait()  # retire the previous copy on this slot
            row_copy(tok, t, slot).start()

    @pl.loop(0, n_prime)
    def _(s):
        row_copy(0, 0, s).wait()


# --------------------------------------------------------------------------------------
# Wrappers
# --------------------------------------------------------------------------------------

def _call_onehot(ids_flat, table, n_tok, cap):
    V, D = table.shape
    itemsize = jnp.dtype(table.dtype).itemsize
    tok_block = _pick_tok_block(n_tok, D * itemsize, onehot_cols_bytes=V * itemsize)
    n_pad = _round_up(n_tok, tok_block)
    ids_col = jnp.pad(ids_flat, (0, n_pad - n_tok)).reshape(n_pad, 1)
    n_blocks = n_pad // tok_block

    need = (2 * V * D + 2 * tok_block * D + tok_block * V) * itemsize + (8 << 20)
    vmem_limit = int(min(cap, max(32 << 20, need)))

    def build(single_buffer):
        return pl.pallas_call(
            _onehot_kernel,
            out_shape=jax.ShapeDtypeStruct((n_pad, D), table.dtype),
            grid=(n_blocks,),
            in_specs=[
                pl.BlockSpec((tok_block, 1), lambda i: (i, 0)),
                _table_spec(V, D, lambda i: (0, 0), single_buffer),
            ],
            out_specs=pl.BlockSpec((tok_block, D), lambda i: (i, 0)),
            compiler_params=pltpu.CompilerParams(
                dimension_semantics=("parallel",),
                vmem_limit_bytes=vmem_limit,
            ),
        )

    try:
        return build(True)(ids_col, table)
    except Exception:
        # pl.Buffered(1) not accepted by this jax/Mosaic version: double-buffered table.
        return build(False)(ids_col, table)


def _call_gather(ids_flat, table, n_tok, cap):
    V, D = table.shape
    itemsize = jnp.dtype(table.dtype).itemsize
    tok_block = _pick_tok_block(n_tok, D * itemsize)
    n_pad = _round_up(n_tok, tok_block)
    ids_pad = jnp.pad(ids_flat, (0, n_pad - n_tok))
    n_blocks = n_pad // tok_block

    need = (2 * V * D + 2 * tok_block * D) * itemsize + (8 << 20)
    vmem_limit = int(min(cap, max(32 << 20, need)))

    def build(single_buffer):
        return pl.pallas_call(
            _gather_kernel,
            out_shape=jax.ShapeDtypeStruct((n_pad, D), table.dtype),
            grid_spec=pltpu.PrefetchScalarGridSpec(
                num_scalar_prefetch=1,                       # flat ids land in SMEM
                grid=(n_blocks,),
                in_specs=[_table_spec(V, D, lambda i, ids: (0, 0), single_buffer)],
                out_specs=pl.BlockSpec((tok_block, D), lambda i, ids: (i, 0)),
            ),
            compiler_params=pltpu.CompilerParams(
                dimension_semantics=("parallel",),
                vmem_limit_bytes=vmem_limit,
            ),
        )

    try:
        return build(True)(ids_pad, table)
    except Exception:
        return build(False)(ids_pad, table)


def _call_hbm(ids_flat, table, n_tok, cap):
    V, D = table.shape
    itemsize = jnp.dtype(table.dtype).itemsize
    tok_block = _pick_tok_block(n_tok, D * itemsize)
    n_pad = _round_up(n_tok, tok_block)
    ids_pad = jnp.pad(ids_flat, (0, n_pad - n_tok))
    n_blocks = n_pad // tok_block

    vmem_limit = int(min(cap, max(32 << 20, 4 * tok_block * D * itemsize + (8 << 20))))

    return pl.pallas_call(
        _hbm_kernel,
        out_shape=jax.ShapeDtypeStruct((n_pad, D), table.dtype),
        grid_spec=pltpu.PrefetchScalarGridSpec(
            num_scalar_prefetch=1,                           # flat ids land in SMEM
            grid=(n_blocks,),
            in_specs=[pl.BlockSpec(memory_space=pl.ANY)],    # table stays in HBM
            out_specs=pl.BlockSpec((tok_block, D), lambda i, ids: (i, 0)),
            scratch_shapes=[pltpu.SemaphoreType.DMA((_NSEM,))],
        ),
        compiler_params=pltpu.CompilerParams(
            dimension_semantics=("parallel",),
            vmem_limit_bytes=vmem_limit,
        ),
    )(ids_pad, table)


def embedding_lookup(ids, table, *, mode="auto"):
    """ids: int array of any shape; table: (V, D). Returns ids.shape + (D,)."""
    orig_shape = ids.shape
    V, D = table.shape
    itemsize = jnp.dtype(table.dtype).itemsize
    cap = _vmem_capacity_bytes()

    flat = jnp.clip(ids.reshape(-1).astype(jnp.int32), 0, V - 1)  # TODO(synk): no raise
    n_tok = int(flat.shape[0])

    if mode == "auto":
        table_resident_bytes = (1 if hasattr(pl, "Buffered") else 2) * V * D * itemsize
        blk_probe = _pick_tok_block(n_tok, D * itemsize)
        fits = (table_resident_bytes + 2 * blk_probe * D * itemsize + (2 << 20)
                <= int(0.70 * cap))
        exact_onehot = itemsize <= 2       # bf16/fp16: MXU one-hot gather is bit-exact
        if fits and exact_onehot and V <= _ONE_HOT_MAX_V:
            mode = "onehot"
        elif fits:
            mode = "gather"
        else:
            mode = "hbm"

    if mode == "onehot":
        out_flat = _call_onehot(flat, table, n_tok, cap)
    elif mode == "gather":
        out_flat = _call_gather(flat, table, n_tok, cap)
    elif mode == "hbm":
        out_flat = _call_hbm(flat, table, n_tok, cap)
    else:
        raise ValueError(f"unknown mode: {mode!r}")

    return out_flat[:n_tok].reshape(*orig_shape, D)


if __name__ == "__main__":
    vocab_size = 32
    embedding_dim = 128   # lane-dense (multiple of 128)
    batch, seq = 2, 8

    key = jax.random.PRNGKey(0)
    k_w, k_ids = jax.random.split(key)

    # nn.Embedding default init: weight ~ N(0, 1), shape (vocab_size, embedding_dim)
    weight = jax.random.normal(k_w, (vocab_size, embedding_dim), dtype=jnp.float32)
    x = jax.random.randint(k_ids, (batch, seq), 0, vocab_size, dtype=jnp.int32)

    ref = jnp.take(weight, x.reshape(-1), axis=0).reshape(batch, seq, embedding_dim)

    # Auto path for an f32 table: VMEM-resident table + grouped-row gather (bit-exact).
    out = jax.block_until_ready(embedding_lookup(x, weight))
    assert out.shape == (batch, seq, embedding_dim)
    assert out.dtype == jnp.float32
    assert jnp.array_equal(out, ref)

    # Vectorized one-hot MXU gather: auto path for 16-bit tables (bit-exact in bf16).
    weight_bf16 = weight.astype(jnp.bfloat16)
    ref_bf16 = jnp.take(weight_bf16, x.reshape(-1), axis=0).reshape(
        batch, seq, embedding_dim)
    out_oh = jax.block_until_ready(embedding_lookup(x, weight_bf16))
    assert out_oh.dtype == jnp.bfloat16
    assert jnp.array_equal(out_oh, ref_bf16)

    # Large-table fallback: table stays in HBM, rows DMA'd straight into the output block.
    out_hbm = jax.block_until_ready(embedding_lookup(x, weight, mode="hbm"))
    assert jnp.array_equal(out_hbm, ref)

    print("KERNEL_OK")
</pallas_src>

<mosaic_0001>
module attributes {stable_mosaic.version = 11 : i64} {
  func.func @_gather_kernel(%arg0: i32, %arg1: memref<16xi32, #tpu.memory_space<smem>>, %arg2: memref<32x128xf32, #tpu.memory_space<vmem>>, %arg3: memref<16x128xf32, #tpu.memory_space<vmem>>) attributes {dimension_semantics = [#tpu.dimension_semantics<parallel>], iteration_bounds = array<i64: 1>, scalar_prefetch = 1 : i64, scratch_operands = 0 : i64, tpu.core_type = #tpu.core_type<tc>, window_params = [{pipeline_mode = #tpu.pipeline_mode<synchronous>, transform_indices = @transform_0, window_bounds = array<i64: 32, 128>}, {transform_indices = @transform_1, window_bounds = array<i64: 16, 128>}]} {
    %c16_i32 = arith.constant 16 : i32
    %0 = arith.muli %arg0, %c16_i32 : i32
    %c0_i32 = arith.constant 0 : i32
    %c2_i32 = arith.constant 2 : i32
    %1 = arith.addi %c0_i32, %c2_i32 : i32
    %c1_i32 = arith.constant 1 : i32
    scf.for %arg4 = %c0_i32 to %1 step %c1_i32  : i32 {
      %c8_i32 = arith.constant 8 : i32
      %2 = arith.muli %arg4, %c8_i32 : i32
      %3 = tpu.assume_multiple %2, 8 : i32
      %4 = arith.addi %0, %3 : i32
      %c0_i32_1 = arith.constant 0 : i32
      %5 = arith.addi %4, %c0_i32_1 : i32
      %6 = arith.index_cast %5 : i32 to index
      %7 = memref.load %arg1[%6] : memref<16xi32, #tpu.memory_space<smem>>
      %8 = arith.index_cast %7 : i32 to index
      %c0 = arith.constant 0 : index
      %9 = vector.load %arg2[%8, %c0] : memref<32x128xf32, #tpu.memory_space<vmem>>, vector<1x128xf32>
      %10 = arith.addi %0, %3 : i32
      %c1_i32_2 = arith.constant 1 : i32
      %11 = arith.addi %10, %c1_i32_2 : i32
      %12 = arith.index_cast %11 : i32 to index
      %13 = memref.load %arg1[%12] : memref<16xi32, #tpu.memory_space<smem>>
      %14 = arith.index_cast %13 : i32 to index
      %c0_3 = arith.constant 0 : index
      %15 = vector.load %arg2[%14, %c0_3] : memref<32x128xf32, #tpu.memory_space<vmem>>, vector<1x128xf32>
      %16 = arith.addi %0, %3 : i32
      %c2_i32_4 = arith.constant 2 : i32
      %17 = arith.addi %16, %c2_i32_4 : i32
      %18 = arith.index_cast %17 : i32 to index
      %19 = memref.load %arg1[%18] : memref<16xi32, #tpu.memory_space<smem>>
      %20 = arith.index_cast %19 : i32 to index
      %c0_5 = arith.constant 0 : index
      %21 = vector.load %arg2[%20, %c0_5] : memref<32x128xf32, #tpu.memory_space<vmem>>, vector<1x128xf32>
      %22 = arith.addi %0, %3 : i32
      %c3_i32 = arith.constant 3 : i32
      %23 = arith.addi %22, %c3_i32 : i32
      %24 = arith.index_cast %23 : i32 to index
      %25 = memref.load %arg1[%24] : memref<16xi32, #tpu.memory_space<smem>>
      %26 = arith.index_cast %25 : i32 to index
      %c0_6 = arith.constant 0 : index
      %27 = vector.load %arg2[%26, %c0_6] : memref<32x128xf32, #tpu.memory_space<vmem>>, vector<1x128xf32>
      %28 = arith.addi %0, %3 : i32
      %c4_i32 = arith.constant 4 : i32
      %29 = arith.addi %28, %c4_i32 : i32
      %30 = arith.index_cast %29 : i32 to index
      %31 = memref.load %arg1[%30] : memref<16xi32, #tpu.memory_space<smem>>
      %32 = arith.index_cast %31 : i32 to index
      %c0_7 = arith.constant 0 : index
      %33 = vector.load %arg2[%32, %c0_7] : memref<32x128xf32, #tpu.memory_space<vmem>>, vector<1x128xf32>
      %34 = arith.addi %0, %3 : i32
      %c5_i32 = arith.constant 5 : i32
      %35 = arith.addi %34, %c5_i32 : i32
      %36 = arith.index_cast %35 : i32 to index
      %37 = memref.load %arg1[%36] : memref<16xi32, #tpu.memory_space<smem>>
      %38 = arith.index_cast %37 : i32 to index
      %c0_8 = arith.constant 0 : index
      %39 = vector.load %arg2[%38, %c0_8] : memref<32x128xf32, #tpu.memory_space<vmem>>, vector<1x128xf32>
      %40 = arith.addi %0, %3 : i32
      %c6_i32 = arith.constant 6 : i32
      %41 = arith.addi %40, %c6_i32 : i32
      %42 = arith.index_cast %41 : i32 to index
      %43 = memref.load %arg1[%42] : memref<16xi32, #tpu.memory_space<smem>>
      %44 = arith.index_cast %43 : i32 to index
      %c0_9 = arith.constant 0 : index
      %45 = vector.load %arg2[%44, %c0_9] : memref<32x128xf32, #tpu.memory_space<vmem>>, vector<1x128xf32>
      %46 = arith.addi %0, %3 : i32
      %c7_i32 = arith.constant 7 : i32
      %47 = arith.addi %46, %c7_i32 : i32
      %48 = arith.index_cast %47 : i32 to index
      %49 = memref.load %arg1[%48] : memref<16xi32, #tpu.memory_space<smem>>
      %50 = arith.index_cast %49 : i32 to index
      %c0_10 = arith.constant 0 : index
      %51 = vector.load %arg2[%50, %c0_10] : memref<32x128xf32, #tpu.memory_space<vmem>>, vector<1x128xf32>
      %52 = tpu.concatenate %9, %15, %21, %27, %33, %39, %45, %51 in 0 : vector<1x128xf32>, vector<1x128xf32>, vector<1x128xf32>, vector<1x128xf32>, vector<1x128xf32>, vector<1x128xf32>, vector<1x128xf32>, vector<1x128xf32> -> vector<8x128xf32>
      %53 = arith.index_cast %3 : i32 to index
      %c0_11 = arith.constant 0 : index
      %54 = vector.load %arg3[%53, %c0_11] : memref<16x128xf32, #tpu.memory_space<vmem>>, vector<8x128xf32>
      tpu.vector_store %arg3[%53, %c0_11], %52 {strides = array<i32>} : memref<16x128xf32, #tpu.memory_space<vmem>>, vector<8x128xf32>,
    }
    %c2_i32_0 = arith.constant 2 : i32
    return
  }
  func.func @transform_0(%arg0: i32, %arg1: memref<16xi32, #tpu.memory_space<smem>>) -> (i32, i32) {
    %c0_i32 = arith.constant 0 : i32
    %c0_i32_0 = arith.constant 0 : i32
    %c0_i32_1 = arith.constant 0 : i32
    return %c0_i32, %c0_i32_0 : i32, i32
  }
  func.func @transform_1(%arg0: i32, %arg1: memref<16xi32, #tpu.memory_space<smem>>) -> (i32, i32) {
    %c0_i32 = arith.constant 0 : i32
    %c0_i32_0 = arith.constant 0 : i32
    return %arg0, %c0_i32 : i32, i32
  }
}

module attributes {stable_mosaic.version = 11 : i64} {
  func.func @_gather_kernel(%arg0: i32, %arg1: memref<16xi32, #tpu.memory_space<smem>>, %arg2: memref<32x128xf32, #tpu.memory_space<vmem>>, %arg3: memref<16x128xf32, #tpu.memory_space<vmem>>) attributes {dimension_semantics = [#tpu.dimension_semantics<parallel>], iteration_bounds = array<i64: 1>, scalar_prefetch = 1 : i64, scratch_operands = 0 : i64, tpu.core_type = #tpu.core_type<tc>, window_params = [{pipeline_mode = #tpu.pipeline_mode<synchronous>, transform_indices = @transform_0, window_bounds = array<i64: 32, 128>}, {transform_indices = @transform_1, window_bounds = array<i64: 16, 128>}]} {
    %c16_i32 = arith.constant 16 : i32
    %0 = arith.muli %arg0, %c16_i32 : i32
    %c0_i32 = arith.constant 0 : i32
    %c2_i32 = arith.constant 2 : i32
    %1 = arith.addi %c0_i32, %c2_i32 : i32
    %c1_i32 = arith.constant 1 : i32
    scf.for %arg4 = %c0_i32 to %1 step %c1_i32  : i32 {
      %c8_i32 = arith.constant 8 : i32
      %2 = arith.muli %arg4, %c8_i32 : i32
      %3 = tpu.assume_multiple %2, 8 : i32
      %4 = arith.addi %0, %3 : i32
      %c0_i32_1 = arith.constant 0 : i32
      %5 = arith.addi %4, %c0_i32_1 : i32
      %6 = arith.index_cast %5 : i32 to index
      %7 = memref.load %arg1[%6] : memref<16xi32, #tpu.memory_space<smem>>
      %8 = arith.index_cast %7 : i32 to index
      %c0 = arith.constant 0 : index
      %9 = vector.load %arg2[%8, %c0] : memref<32x128xf32, #tpu.memory_space<vmem>>, vector<1x128xf32>
      %10 = arith.addi %0, %3 : i32
      %c1_i32_2 = arith.constant 1 : i32
      %11 = arith.addi %10, %c1_i32_2 : i32
      %12 = arith.index_cast %11 : i32 to index
      %13 = memref.load %arg1[%12] : memref<16xi32, #tpu.memory_space<smem>>
      %14 = arith.index_cast %13 : i32 to index
      %c0_3 = arith.constant 0 : index
      %15 = vector.load %arg2[%14, %c0_3] : memref<32x128xf32, #tpu.memory_space<vmem>>, vector<1x128xf32>
      %16 = arith.addi %0, %3 : i32
      %c2_i32_4 = arith.constant 2 : i32
      %17 = arith.addi %16, %c2_i32_4 : i32
      %18 = arith.index_cast %17 : i32 to index
      %19 = memref.load %arg1[%18] : memref<16xi32, #tpu.memory_space<smem>>
      %20 = arith.index_cast %19 : i32 to index
      %c0_5 = arith.constant 0 : index
      %21 = vector.load %arg2[%20, %c0_5] : memref<32x128xf32, #tpu.memory_space<vmem>>, vector<1x128xf32>
      %22 = arith.addi %0, %3 : i32
      %c3_i32 = arith.constant 3 : i32
      %23 = arith.addi %22, %c3_i32 : i32
      %24 = arith.index_cast %23 : i32 to index
      %25 = memref.load %arg1[%24] : memref<16xi32, #tpu.memory_space<smem>>
      %26 = arith.index_cast %25 : i32 to index
      %c0_6 = arith.constant 0 : index
      %27 = vector.load %arg2[%26, %c0_6] : memref<32x128xf32, #tpu.memory_space<vmem>>, vector<1x128xf32>
      %28 = arith.addi %0, %3 : i32
      %c4_i32 = arith.constant 4 : i32
      %29 = arith.addi %28, %c4_i32 : i32
      %30 = arith.index_cast %29 : i32 to index
      %31 = memref.load %arg1[%30] : memref<16xi32, #tpu.memory_space<smem>>
      %32 = arith.index_cast %31 : i32 to index
      %c0_7 = arith.constant 0 : index
      %33 = vector.load %arg2[%32, %c0_7] : memref<32x128xf32, #tpu.memory_space<vmem>>, vector<1x128xf32>
      %34 = arith.addi %0, %3 : i32
      %c5_i32 = arith.constant 5 : i32
      %35 = arith.addi %34, %c5_i32 : i32
      %36 = arith.index_cast %35 : i32 to index
      %37 = memref.load %arg1[%36] : memref<16xi32, #tpu.memory_space<smem>>
      %38 = arith.index_cast %37 : i32 to index
      %c0_8 = arith.constant 0 : index
      %39 = vector.load %arg2[%38, %c0_8] : memref<32x128xf32, #tpu.memory_space<vmem>>, vector<1x128xf32>
      %40 = arith.addi %0, %3 : i32
      %c6_i32 = arith.constant 6 : i32
      %41 = arith.addi %40, %c6_i32 : i32
      %42 = arith.index_cast %41 : i32 to index
      %43 = memref.load %arg1[%42] : memref<16xi32, #tpu.memory_space<smem>>
      %44 = arith.index_cast %43 : i32 to index
      %c0_9 = arith.constant 0 : index
      %45 = vector.load %arg2[%44, %c0_9] : memref<32x128xf32, #tpu.memory_space<vmem>>, vector<1x128xf32>
      %46 = arith.addi %0, %3 : i32
      %c7_i32 = arith.constant 7 : i32
      %47 = arith.addi %46, %c7_i32 : i32
      %48 = arith.index_cast %47 : i32 to index
      %49 = memref.load %arg1[%48] : memref<16xi32, #tpu.memory_space<smem>>
      %50 = arith.index_cast %49 : i32 to index
      %c0_10 = arith.constant 0 : index
      %51 = vector.load %arg2[%50, %c0_10] : memref<32x128xf32, #tpu.memory_space<vmem>>, vector<1x128xf32>
      %52 = tpu.concatenate %9, %15, %21, %27, %33, %39, %45, %51 in 0 : vector<1x128xf32>, vector<1x128xf32>, vector<1x128xf32>, vector<1x128xf32>, vector<1x128xf32>, vector<1x128xf32>, vector<1x128xf32>, vector<1x128xf32> -> vector<8x128xf32>
      %53 = arith.index_cast %3 : i32 to index
      %c0_11 = arith.constant 0 : index
      %54 = vector.load %arg3[%53, %c0_11] : memref<16x128xf32, #tpu.memory_space<vmem>>, vector<8x128xf32>
      tpu.vector_store %arg3[%53, %c0_11], %52 {strides = array<i32>} : memref<16x128xf32, #tpu.memory_space<vmem>>, vector<8x128xf32>,
    }
    %c2_i32_0 = arith.constant 2 : i32
    return
  }
  func.func @transform_0(%arg0: i32, %arg1: memref<16xi32, #tpu.memory_space<smem>>) -> (i32, i32) {
    %c0_i32 = arith.constant 0 : i32
    %c0_i32_0 = arith.constant 0 : i32
    %c0_i32_1 = arith.constant 0 : i32
    return %c0_i32, %c0_i32_0 : i32, i32
  }
  func.func @transform_1(%arg0: i32, %arg1: memref<16xi32, #tpu.memory_space<smem>>) -> (i32, i32) {
    %c0_i32 = arith.constant 0 : i32
    %c0_i32_0 = arith.constant 0 : i32
    return %arg0, %c0_i32 : i32, i32
  }
}

</mosaic_0001>

<bundles_post_ra>
// kernel: tpu_custom_call.1
= control target key start
LH: loop header
LB: loop body
LE: loop exit
PB: predicated region body
PF: predicated region fallthrough
CT: control target
= control target key end

     0   :  { %s213_s9 = smov [#allocation3]   ;;  %s269_s0 = inlined_call_operand.hbm [shape: s32[16], index: 0, kind: input, shape index: {}]   ;;  %s270_s1 = inlined_call_operand.hbm [shape: f32[32,128], index: 1, kind: input, shape index: {}]   ;;  %s271_s2 = inlined_call_operand.hbm [shape: f32[16,128], index: 2, kind: output, shape index: {}]  }
   0x1   :  { %8 = dma.hbm_to_smem %s269_s0, 16, %s213_s9, [#allocation2] }
   0x2   :  { %203 = dma.done.wait [#allocation2], 16 }
   0x3   :  { %204 = vsyncadd [#allocation2], 4294967280 }
   0x4   :  { %10 = sfence }
   0x5   :  { %11 = vsyncpa [#allocation5], 0 }
   0x6   :  { %12 = vsyncpa [#allocation6], 0  ;;  %s214_s12 = smov [#allocation4]  }
   0x7   :  { %s18_s13 = sshll.u32 %s214_s12, 4  ;;  %s19_s13 = int_to_ptr.vmem [resolvable:$true] %s18_s13 }
   0x8   :  { %s167_s14 = scalar_lea.vmem %s19_s13, 512  ;;  %p172_p1 = scmp.lt.s32.totalorder %s19_s13, %s19_s13 }
   0x9   :  { %p168_p0 = scmp.ne.s32.totalorder %s19_s13, %s167_s14  ;;  %p173_p2 = scmp.lt.s32.totalorder %s167_s14, %s167_s14 }
   0xb   :  { %p174_p3 = por %p173_p2, %p172_p1 }
   0xd   :  { %p175_p4 = pnand %p174_p3, %p168_p0 }
   0xf   :  { %178 = shalt.err (!%p175_p4)
}
  0x10   :  { %s215_s15 = smov 128   ;;  %s216_s16 = smov 8  }
  0x11   :  { %24 = dma.hbm_to_vmem [thread:$0]  %s270_s1, 512, %s19_s13, [#allocation5], %s215_s15, %s215_s15, %s216_s16  }
  0x12   :  { %205 = dma.done.wait [#allocation5], 512  }
  0x13   :  { %206 = vsyncadd [#allocation5], 4294966784  ;;  %s242_s18 = smov 0  }
  0x14 LB: > { %s248_s19 = sshll.u32 %s211_s18, 3  ;;  %vm89_vm0 = vcmask 1040384   ;;  %vm91_vm1 = vcmask 1041408   ;;  %vm93_vm2 = vcmask 1042432   ;;  %vm95_vm3 = vcmask 1043456   ;;  %s34_s18 = sadd.s32 1, %s211_s18   ;;  %s211_s18 = sphi %s242_s18, %s34_s18  }
  0x15   : > { %s37_s1 = sld [smem:[#allocation3 + %s248_s19]]  ;;  %s40_s20 = sadd.s32 1, %s248_s19  ;;  %vm97_vm4 = vcmask 1044480   ;;  %vm99_vm5 = vcmask 1045504   ;;  %vm101_vm6 = vcmask 1046528  }
  0x16   : > { %s41_s21 = sld [smem:[#allocation3 + %s40_s20]]  ;;  %s44_s22 = sadd.s32 2, %s248_s19 }
  0x17   : > { %s45_s23 = sld [smem:[#allocation3 + %s44_s22]]  ;;  %s48_s24 = sadd.s32 3, %s248_s19 }
  0x18   : > { %s49_s25 = sld [smem:[#allocation3 + %s48_s24]]  ;;  %s52_s26 = sadd.s32 4, %s248_s19 }
  0x19   : > { %s53_s27 = sld [smem:[#allocation3 + %s52_s26]]  ;;  %s56_s28 = sadd.s32 5, %s248_s19 }
  0x1a   : > { %s57_s29 = sld [smem:[#allocation3 + %s56_s28]]  ;;  %s60_s30 = sadd.s32 6, %s248_s19 }
  0x1b   : > { %s61_s3 = sld [smem:[#allocation3 + %s60_s30]]  ;;  %s64_s4 = sadd.s32 7, %s248_s19 }
  0x1c   : > { %s38_s5 = scalar_lea.vmem [#allocation4], %s37_s1  ;;  %s42_s6 = scalar_lea.vmem [#allocation4], %s41_s21 }
  0x1d   : > { %v39_v0 = vld [vmem:[%s38_s5] sm:$0x1]  ;;  %s65_s7 = sld [smem:[#allocation3 + %s64_s4]]  ;;  %s46_s8 = scalar_lea.vmem [#allocation4], %s45_s23 }
  0x1e   : > { %v43_v1 = vld [vmem:[%s42_s6] sm:$0x1]  ;;  %s50_s9 = scalar_lea.vmem [#allocation4], %s49_s25  ;;  %s103_s14 = scalar_lea.vmem [#allocation7], %s248_s19 }
  0x1f   : > { %v47_v2 = vld [vmem:[%s46_s8] sm:$0x1]  ;;  %v69_v3 = vrot.slane %v43_v1, 7  ;;  %s54_s10 = scalar_lea.vmem [#allocation4], %s53_s27  ;;  %p31_p5 = scmp.ge.s32.totalorder %s34_s18, 2  }
  0x20   : > { %v51_v4 = vld [vmem:[%s50_s9] sm:$0x1]  ;;  %v72_v5 = vrot.slane %v47_v2, 6  ;;  %s58_s11 = scalar_lea.vmem [#allocation4], %s57_s29  ;;  %s217_s0 = smov (%p31_p5), [#allocation7]  }
  0x21   : > { %v55_v6 = vld [vmem:[%s54_s10] sm:$0x1]  ;;  %v75_v7 = vrot.slane %v51_v4, 5  ;;  %v90_v8 = vsel %vm89_vm0, %v39_v0, %v69_v3  ;;  %s62_s12 = scalar_lea.vmem [#allocation4], %s61_s3  ;;  %s110_s17 = sshll.u32 (%p31_p5), %s217_s0, 4  ;;  %s111_s17 = int_to_ptr.vmem [resolvable:$true] %s110_s17 }
  0x22   : > { %v59_v9 = vld [vmem:[%s58_s11] sm:$0x1]  ;;  %v78_v10 = vrot.slane %v55_v6, 4  ;;  %v92_v11 = vsel %vm91_vm1, %v90_v8, %v72_v5  ;;  %s179_s1 = scalar_lea.vmem (%p31_p5), %s111_s17, 256  ;;  %p184_p7 = scmp.lt.s32.totalorder (%p31_p5), %s111_s17, %s111_s17 }
  0x23   : > { %v63_v12 = vld [vmem:[%s62_s12] sm:$0x1]  ;;  %v81_v13 = vrot.slane %v59_v9, 3  ;;  %v94_v14 = vsel %vm93_vm2, %v92_v11, %v75_v7  ;;  %s66_s13 = scalar_lea.vmem [#allocation4], %s65_s7  ;;  %p180_p6 = scmp.ne.s32.totalorder (%p31_p5), %s111_s17, %s179_s1 }
  0x24   : > { %v84_v15 = vrot.slane %v63_v12, 2  ;;  %v96_v16 = vsel %vm95_vm3, %v94_v14, %v78_v10  ;;  %v67_v17 = vld [vmem:[%s66_s13] sm:$0x1]  ;;  %33 = sbr.rel (!%p31_p5) target bundleno = 20 (0x14), region = 44  ;;  %p185_p8 = scmp.lt.s32.totalorder (%p31_p5), %s179_s1, %s179_s1 }
  0x25   : > { %v98_v18 = vsel %vm97_vm4, %v96_v16, %v81_v13  ;;  %v87_v19 = vrot.slane %v67_v17, 1 }
  0x26   : > { %v100_v20 = vsel %vm99_vm5, %v98_v18, %v84_v15  ;;  %p186_p9 = por (%p31_p5), %p185_p8, %p184_p7 }
  0x27   : > { %v102_v21 = vsel %vm101_vm6, %v100_v20, %v87_v19 }
  0x28   : > { %104 = vst [vmem:[%s103_s14] sm:$0xff] %v102_v21  ;;  %p187_p10 = pnand (%p31_p5), %p186_p9, %p180_p6 }
  0x2a   :  { %190 = shalt.err (!%p187_p10)
}
  0x2b   :  { %116 = dma.vmem_to_hbm [thread:$0]  %s111_s17, 256, %s271_s2, [#allocation6], %s215_s15, %s215_s15, %s216_s16  }
  0x2c   :  { %207 = dma.done.wait [#allocation6], 256  }
  0x2d   :  { %208 = vsyncadd [#allocation6], 4294967040 }
  0x2e   :  { %120 = vsyncpa [#allocation5], 1 }
  0x2f   :  { %121 = vsyncpa [#allocation6], 1 }

// kernel: tpu_custom_call.1
= control target key start
LH: loop header
LB: loop body
LE: loop exit
PB: predicated region body
PF: predicated region fallthrough
CT: control target
= control target key end

     0   :  { %s213_s9 = smov [#allocation3]   ;;  %s269_s0 = inlined_call_operand.hbm [shape: s32[16], index: 0, kind: input, shape index: {}]   ;;  %s270_s1 = inlined_call_operand.hbm [shape: f32[32,128], index: 1, kind: input, shape index: {}]   ;;  %s271_s2 = inlined_call_operand.hbm [shape: f32[16,128], index: 2, kind: output, shape index: {}]  }
   0x1   :  { %8 = dma.hbm_to_smem %s269_s0, 16, %s213_s9, [#allocation2] }
   0x2   :  { %203 = dma.done.wait [#allocation2], 16 }
   0x3   :  { %204 = vsyncadd [#allocation2], 4294967280 }
   0x4   :  { %10 = sfence }
   0x5   :  { %11 = vsyncpa [#allocation5], 0 }
   0x6   :  { %12 = vsyncpa [#allocation6], 0  ;;  %s214_s12 = smov [#allocation4]  }
   0x7   :  { %s18_s13 = sshll.u32 %s214_s12, 4  ;;  %s19_s13 = int_to_ptr.vmem [resolvable:$true] %s18_s13 }
   0x8   :  { %s167_s14 = scalar_lea.vmem %s19_s13, 512  ;;  %p172_p1 = scmp.lt.s32.totalorder %s19_s13, %s19_s13 }
   0x9   :  { %p168_p0 = scmp.ne.s32.totalorder %s19_s13, %s167_s14  ;;  %p173_p2 = scmp.lt.s32.totalorder %s167_s14, %s167_s14 }
   0xb   :  { %p174_p3 = por %p173_p2, %p172_p1 }
   0xd   :  { %p175_p4 = pnand %p174_p3, %p168_p0 }
   0xf   :  { %178 = shalt.err (!%p175_p4)
}
  0x10   :  { %s215_s15 = smov 128   ;;  %s216_s16 = smov 8  }
  0x11   :  { %24 = dma.hbm_to_vmem [thread:$0]  %s270_s1, 512, %s19_s13, [#allocation5], %s215_s15, %s215_s15, %s216_s16  }
  0x12   :  { %205 = dma.done.wait [#allocation5], 512  }
  0x13   :  { %206 = vsyncadd [#allocation5], 4294966784  ;;  %s242_s18 = smov 0  }
  0x14 LB: > { %s248_s19 = sshll.u32 %s211_s18, 3  ;;  %vm89_vm0 = vcmask 1040384   ;;  %vm91_vm1 = vcmask 1041408   ;;  %vm93_vm2 = vcmask 1042432   ;;  %vm95_vm3 = vcmask 1043456   ;;  %s34_s18 = sadd.s32 1, %s211_s18   ;;  %s211_s18 = sphi %s242_s18, %s34_s18  }
  0x15   : > { %s37_s1 = sld [smem:[#allocation3 + %s248_s19]]  ;;  %s40_s20 = sadd.s32 1, %s248_s19  ;;  %vm97_vm4 = vcmask 1044480   ;;  %vm99_vm5 = vcmask 1045504   ;;  %vm101_vm6 = vcmask 1046528  }
  0x16   : > { %s41_s21 = sld [smem:[#allocation3 + %s40_s20]]  ;;  %s44_s22 = sadd.s32 2, %s248_s19 }
  0x17   : > { %s45_s23 = sld [smem:[#allocation3 + %s44_s22]]  ;;  %s48_s24 = sadd.s32 3, %s248_s19 }
  0x18   : > { %s49_s25 = sld [smem:[#allocation3 + %s48_s24]]  ;;  %s52_s26 = sadd.s32 4, %s248_s19 }
  0x19   : > { %s53_s27 = sld [smem:[#allocation3 + %s52_s26]]  ;;  %s56_s28 = sadd.s32 5, %s248_s19 }
  0x1a   : > { %s57_s29 = sld [smem:[#allocation3 + %s56_s28]]  ;;  %s60_s30 = sadd.s32 6, %s248_s19 }
  0x1b   : > { %s61_s3 = sld [smem:[#allocation3 + %s60_s30]]  ;;  %s64_s4 = sadd.s32 7, %s248_s19 }
  0x1c   : > { %s38_s5 = scalar_lea.vmem [#allocation4], %s37_s1  ;;  %s42_s6 = scalar_lea.vmem [#allocation4], %s41_s21 }
  0x1d   : > { %v39_v0 = vld [vmem:[%s38_s5] sm:$0x1]  ;;  %s65_s7 = sld [smem:[#allocation3 + %s64_s4]]  ;;  %s46_s8 = scalar_lea.vmem [#allocation4], %s45_s23 }
  0x1e   : > { %v43_v1 = vld [vmem:[%s42_s6] sm:$0x1]  ;;  %s50_s9 = scalar_lea.vmem [#allocation4], %s49_s25  ;;  %s103_s14 = scalar_lea.vmem [#allocation7], %s248_s19 }
  0x1f   : > { %v47_v2 = vld [vmem:[%s46_s8] sm:$0x1]  ;;  %v69_v3 = vrot.slane %v43_v1, 7  ;;  %s54_s10 = scalar_lea.vmem [#allocation4], %s53_s27  ;;  %p31_p5 = scmp.ge.s32.totalorder %s34_s18, 2  }
  0x20   : > { %v51_v4 = vld [vmem:[%s50_s9] sm:$0x1]  ;;  %v72_v5 = vrot.slane %v47_v2, 6  ;;  %s58_s11 = scalar_lea.vmem [#allocation4], %s57_s29  ;;  %s217_s0 = smov (%p31_p5), [#allocation7]  }
  0x21   : > { %v55_v6 = vld [vmem:[%s54_s10] sm:$0x1]  ;;  %v75_v7 = vrot.slane %v51_v4, 5  ;;  %v90_v8 = vsel %vm89_vm0, %v39_v0, %v69_v3  ;;  %s62_s12 = scalar_lea.vmem [#allocation4], %s61_s3  ;;  %s110_s17 = sshll.u32 (%p31_p5), %s217_s0, 4  ;;  %s111_s17 = int_to_ptr.vmem [resolvable:$true] %s110_s17 }
  0x22   : > { %v59_v9 = vld [vmem:[%s58_s11] sm:$0x1]  ;;  %v78_v10 = vrot.slane %v55_v6, 4  ;;  %v92_v11 = vsel %vm91_vm1, %v90_v8, %v72_v5  ;;  %s179_s1 = scalar_lea.vmem (%p31_p5), %s111_s17, 256  ;;  %p184_p7 = scmp.lt.s32.totalorder (%p31_p5), %s111_s17, %s111_s17 }
  0x23   : > { %v63_v12 = vld [vmem:[%s62_s12] sm:$0x1]  ;;  %v81_v13 = vrot.slane %v59_v9, 3  ;;  %v94_v14 = vsel %vm93_vm2, %v92_v11, %v75_v7  ;;  %s66_s13 = scalar_lea.vmem [#allocation4], %s65_s7  ;;  %p180_p6 = scmp.ne.s32.totalorder (%p31_p5), %s111_s17, %s179_s1 }
  0x24   : > { %v84_v15 = vrot.slane %v63_v12, 2  ;;  %v96_v16 = vsel %vm95_vm3, %v94_v14, %v78_v10  ;;  %v67_v17 = vld [vmem:[%s66_s13] sm:$0x1]  ;;  %33 = sbr.rel (!%p31_p5) target bundleno = 20 (0x14), region = 44  ;;  %p185_p8 = scmp.lt.s32.totalorder (%p31_p5), %s179_s1, %s179_s1 }
  0x25   : > { %v98_v18 = vsel %vm97_vm4, %v96_v16, %v81_v13  ;;  %v87_v19 = vrot.slane %v67_v17, 1 }
  0x26   : > { %v100_v20 = vsel %vm99_vm5, %v98_v18, %v84_v15  ;;  %p186_p9 = por (%p31_p5), %p185_p8, %p184_p7 }
  0x27   : > { %v102_v21 = vsel %vm101_vm6, %v100_v20, %v87_v19 }
  0x28   : > { %104 = vst [vmem:[%s103_s14] sm:$0xff] %v102_v21  ;;  %p187_p10 = pnand (%p31_p5), %p186_p9, %p180_p6 }
  0x2a   :  { %190 = shalt.err (!%p187_p10)
}
  0x2b   :  { %116 = dma.vmem_to_hbm [thread:$0]  %s111_s17, 256, %s271_s2, [#allocation6], %s215_s15, %s215_s15, %s216_s16  }
  0x2c   :  { %207 = dma.done.wait [#allocation6], 256  }
  0x2d   :  { %208 = vsyncadd [#allocation6], 4294967040 }
  0x2e   :  { %120 = vsyncpa [#allocation5], 1 }
  0x2f   :  { %121 = vsyncpa [#allocation6], 1 }

</bundles_post_ra>
